<compile_context>
chip_gen: v5e
topology: v5e:2x2
jax: 0.10.0
libtpu: 0.0.40
codegen_flags: <defaults>
</compile_context>

<pallas_src>
import functools

import jax
import jax.numpy as jnp
from jax.experimental import pallas as pl
from jax.experimental.pallas import tpu as pltpu

EPS = -0.03          # VelocityAABB.__init__ default (box test uses -1+eps / 1-eps)
D_IN = 4             # (x, y, z, t)
HIDDEN = 32
D_VEL = 4            # vel_net.get_vel output width (we slice [..., :3] -> [:3, :])
TILE_N = 4096        # points per grid step (multiple of 128); sweep 2048-8192


def _velocity_aabb_kernel(x_ref, w1_ref, b1_ref, w2_ref, b2_ref, w3_ref, b3_ref,
                          out_ref, *, eps):
    # x_ref: (D_IN, tile_n) VMEM tile — points on the lane axis.
    x = x_ref[...]                                           # (D_IN, tile_n) f32
    pts = x[:3, :]                                           # (3, tile_n)

    lo = -1.0 + eps
    hi = 1.0 - eps
    # per-lane AABB test; sublane reduce over the 3 spatial coords -> (1, tile_n)
    out_of_box = jnp.any((pts < lo) | (pts > hi), axis=0, keepdims=True)

    # vel_net.get_vel : 3-layer MLP with ReLU, features on sublanes, points on lanes.
    h = jnp.dot(w1_ref[...], x, preferred_element_type=jnp.float32) + b1_ref[...]
    h = jnp.maximum(h, 0.0)
    h = jnp.dot(w2_ref[...], h, preferred_element_type=jnp.float32) + b2_ref[...]
    h = jnp.maximum(h, 0.0)
    v = jnp.dot(w3_ref[...], h, preferred_element_type=jnp.float32) + b3_ref[...]

    vel = jnp.where(out_of_box, 0.0, v[:3, :])               # zero outside the AABB
    out_ref[...] = vel.astype(out_ref.dtype)                 # lane-dense (3, tile_n) store


def velocity_aabb(xt, params, *, eps=EPS, tile_n=TILE_N):
    """xt: (..., D_IN) float32 -> velocity (..., 3) float32."""
    w1, b1, w2, b2, w3, b3 = params
    lead_shape = xt.shape[:-1]
    d_in = xt.shape[-1]

    # Lane-dense layout: points on the last (lane) axis.
    x_t = xt.reshape(-1, d_in).T                             # (d_in, N)
    n = x_t.shape[1]

    # Pre-transpose weights/biases so the kernel computes W @ x (features on sublanes).
    w1t, w2t, w3t = w1.T, w2.T, w3.T                         # (H,d_in), (H,H), (D_VEL,H)
    b1t, b2t, b3t = b1.T, b2.T, b3.T                         # (H,1), (H,1), (D_VEL,1)

    # Tile the point axis.  For small inputs use a single full block (last dim ==
    # full array dim satisfies the lane constraint); otherwise a multiple of 128
    # with Pallas masking the ragged final block.
    # (On v7x prefer a tile_n giving >= 2 parallel blocks so both TCs get work.)
    if n <= tile_n:
        tile_n = n
    else:
        tile_n = max(128, (tile_n // 128) * 128)
    grid = (pl.cdiv(n, tile_n),)

    kernel = functools.partial(_velocity_aabb_kernel, eps=eps)
    resident = lambda a: pl.BlockSpec(a.shape, lambda i: (0, 0))  # VMEM-resident weights

    out = pl.pallas_call(
        kernel,
        out_shape=jax.ShapeDtypeStruct((3, n), jnp.float32),
        grid_spec=pltpu.PrefetchScalarGridSpec(
            num_scalar_prefetch=0,
            grid=grid,
            in_specs=[
                pl.BlockSpec((d_in, tile_n), lambda i: (0, i)),   # points tile
                resident(w1t), resident(b1t),
                resident(w2t), resident(b2t),
                resident(w3t), resident(b3t),
            ],
            out_specs=pl.BlockSpec((3, tile_n), lambda i: (0, i)),
        ),
        compiler_params=pltpu.CompilerParams(
            dimension_semantics=("parallel",)),
    )(x_t, w1t, b1t, w2t, b2t, w3t, b3t)

    return out.T.reshape(*lead_shape, 3)


def _make_params(key):
    k1, k2, k3 = jax.random.split(key, 3)
    w1 = jax.random.normal(k1, (D_IN, HIDDEN), jnp.float32) * 0.3
    b1 = jnp.zeros((1, HIDDEN), jnp.float32)
    w2 = jax.random.normal(k2, (HIDDEN, HIDDEN), jnp.float32) * 0.2
    b2 = jnp.zeros((1, HIDDEN), jnp.float32)
    w3 = jax.random.normal(k3, (HIDDEN, D_VEL), jnp.float32) * 0.2
    b3 = jnp.zeros((1, D_VEL), jnp.float32)
    return (w1, b1, w2, b2, w3, b3)


def _reference(xt, params, eps=EPS):
    w1, b1, w2, b2, w3, b3 = params
    pts = xt[..., :3]
    mask_out = jnp.any((pts < -1.0 + eps) | (pts > 1.0 - eps), axis=-1)
    h = jnp.maximum(xt @ w1 + b1, 0.0)
    h = jnp.maximum(h @ w2 + b2, 0.0)
    v = (h @ w3 + b3)[..., :3]
    return jnp.where(mask_out[..., None], 0.0, v)


if __name__ == "__main__":
    key = jax.random.PRNGKey(0)
    kp, kx = jax.random.split(key)
    params = _make_params(kp)

    # small shape consistent with the module: batch of rays x samples x (xyz, t)
    xt = jax.random.uniform(kx, (2, 100, D_IN), jnp.float32, minval=-1.5, maxval=1.5)

    vel = velocity_aabb(xt, params)
    vel = jax.block_until_ready(vel)

    ref = _reference(xt, params)
    assert vel.shape == (2, 100, 3)
    assert jnp.allclose(vel, ref, atol=1e-5, rtol=1e-5), float(jnp.abs(vel - ref).max())
    print("KERNEL_OK")
</pallas_src>

<mosaic_0001>
module attributes {stable_mosaic.version = 11 : i64} {
  func.func @_velocity_aabb_kernel(%arg0: i32, %arg1: memref<4x200xf32, #tpu.memory_space<vmem>>, %arg2: memref<32x4xf32, #tpu.memory_space<vmem>>, %arg3: memref<32x1xf32, #tpu.memory_space<vmem>>, %arg4: memref<32x32xf32, #tpu.memory_space<vmem>>, %arg5: memref<32x1xf32, #tpu.memory_space<vmem>>, %arg6: memref<4x32xf32, #tpu.memory_space<vmem>>, %arg7: memref<4x1xf32, #tpu.memory_space<vmem>>, %arg8: memref<3x200xf32, #tpu.memory_space<vmem>>) attributes {dimension_semantics = [#tpu.dimension_semantics<parallel>], iteration_bounds = array<i64: 1>, scalar_prefetch = 0 : i64, scratch_operands = 0 : i64, tpu.core_type = #tpu.core_type<tc>, window_params = [{transform_indices = @transform_0, window_bounds = array<i64: 4, 200>}, {pipeline_mode = #tpu.pipeline_mode<synchronous>, transform_indices = @transform_1, window_bounds = array<i64: 32, 4>}, {pipeline_mode = #tpu.pipeline_mode<synchronous>, transform_indices = @transform_2, window_bounds = array<i64: 32, 1>}, {pipeline_mode = #tpu.pipeline_mode<synchronous>, transform_indices = @transform_3, window_bounds = array<i64: 32, 32>}, {pipeline_mode = #tpu.pipeline_mode<synchronous>, transform_indices = @transform_4, window_bounds = array<i64: 32, 1>}, {pipeline_mode = #tpu.pipeline_mode<synchronous>, transform_indices = @transform_5, window_bounds = array<i64: 4, 32>}, {pipeline_mode = #tpu.pipeline_mode<synchronous>, transform_indices = @transform_6, window_bounds = array<i64: 4, 1>}, {transform_indices = @transform_7, window_bounds = array<i64: 3, 200>}]} {
    %c0 = arith.constant 0 : index
    %c0_0 = arith.constant 0 : index
    %0 = vector.load %arg1[%c0, %c0_0] : memref<4x200xf32, #tpu.memory_space<vmem>>, vector<4x200xf32>
    %1 = vector.extract_strided_slice %0 {offsets = [0, 0], sizes = [3, 200], strides = [1, 1]} : vector<4x200xf32> to vector<3x200xf32>
    %cst = arith.constant -1.030000e+00 : f32
    %2 = vector.broadcast %cst : f32 to vector<3x200xf32>
    %3 = arith.cmpf olt, %1, %2 : vector<3x200xf32>
    %cst_1 = arith.constant 1.030000e+00 : f32
    %4 = vector.broadcast %cst_1 : f32 to vector<3x200xf32>
    %5 = arith.cmpf ogt, %1, %4 : vector<3x200xf32>
    %6 = arith.ori %3, %5 : vector<3x200xi1>
    %cst_2 = arith.constant 1.000000e+00 : f32
    %cst_3 = arith.constant 0.000000e+00 : f32
    %7 = vector.broadcast %cst_2 : f32 to vector<3x200xf32>
    %8 = vector.broadcast %cst_3 : f32 to vector<3x200xf32>
    %9 = arith.select %6, %7, %8 : vector<3x200xi1>, vector<3x200xf32>
    %cst_4 = arith.constant dense<0xFF800000> : vector<200xf32>
    %10 = vector.multi_reduction <maximumf>, %9, %cst_4 [0] : vector<3x200xf32> to vector<200xf32>
    %cst_5 = arith.constant 0.000000e+00 : f32
    %11 = vector.broadcast %cst_5 : f32 to vector<200xf32>
    %12 = arith.cmpf ogt, %10, %11 : vector<200xf32>
    %13 = vector.shape_cast %12 : vector<200xi1> to vector<1x200xi1>
    %c0_6 = arith.constant 0 : index
    %c0_7 = arith.constant 0 : index
    %14 = vector.load %arg2[%c0_6, %c0_7] : memref<32x4xf32, #tpu.memory_space<vmem>>, vector<32x4xf32>
    %cst_8 = arith.constant dense<0.000000e+00> : vector<32x200xf32>
    %15 = tpu.matmul %14, %0, %cst_8 {dimension_numbers = #tpu.dot_dimension_numbers<[1], [0], [0], [1], [0, 0, 1, 1], [], []>} : vector<32x4xf32>, vector<4x200xf32>, vector<32x200xf32> -> vector<32x200xf32>
    %c0_9 = arith.constant 0 : index
    %c0_10 = arith.constant 0 : index
    %16 = vector.load %arg3[%c0_9, %c0_10] : memref<32x1xf32, #tpu.memory_space<vmem>>, vector<32x1xf32>
    %17 = vector.broadcast %16 : vector<32x1xf32> to vector<32x200xf32>
    %18 = arith.addf %15, %17 : vector<32x200xf32>
    %cst_11 = arith.constant 0.000000e+00 : f32
    %19 = vector.broadcast %cst_11 : f32 to vector<32x200xf32>
    %20 = arith.maximumf %18, %19 : vector<32x200xf32>
    %c0_12 = arith.constant 0 : index
    %c0_13 = arith.constant 0 : index
    %21 = vector.load %arg4[%c0_12, %c0_13] : memref<32x32xf32, #tpu.memory_space<vmem>>, vector<32x32xf32>
    %cst_14 = arith.constant dense<0.000000e+00> : vector<32x200xf32>
    %22 = tpu.matmul %21, %20, %cst_14 {dimension_numbers = #tpu.dot_dimension_numbers<[1], [0], [0], [1], [0, 0, 1, 1], [], []>} : vector<32x32xf32>, vector<32x200xf32>, vector<32x200xf32> -> vector<32x200xf32>
    %c0_15 = arith.constant 0 : index
    %c0_16 = arith.constant 0 : index
    %23 = vector.load %arg5[%c0_15, %c0_16] : memref<32x1xf32, #tpu.memory_space<vmem>>, vector<32x1xf32>
    %24 = vector.broadcast %23 : vector<32x1xf32> to vector<32x200xf32>
    %25 = arith.addf %22, %24 : vector<32x200xf32>
    %cst_17 = arith.constant 0.000000e+00 : f32
    %26 = vector.broadcast %cst_17 : f32 to vector<32x200xf32>
    %27 = arith.maximumf %25, %26 : vector<32x200xf32>
    %c0_18 = arith.constant 0 : index
    %c0_19 = arith.constant 0 : index
    %28 = vector.load %arg6[%c0_18, %c0_19] : memref<4x32xf32, #tpu.memory_space<vmem>>, vector<4x32xf32>
    %cst_20 = arith.constant dense<0.000000e+00> : vector<4x200xf32>
    %29 = tpu.matmul %28, %27, %cst_20 {dimension_numbers = #tpu.dot_dimension_numbers<[1], [0], [0], [1], [0, 0, 1, 1], [], []>} : vector<4x32xf32>, vector<32x200xf32>, vector<4x200xf32> -> vector<4x200xf32>
    %c0_21 = arith.constant 0 : index
    %c0_22 = arith.constant 0 : index
    %30 = vector.load %arg7[%c0_21, %c0_22] : memref<4x1xf32, #tpu.memory_space<vmem>>, vector<4x1xf32>
    %31 = vector.broadcast %30 : vector<4x1xf32> to vector<4x200xf32>
    %32 = arith.addf %29, %31 : vector<4x200xf32>
    %33 = vector.extract_strided_slice %32 {offsets = [0, 0], sizes = [3, 200], strides = [1, 1]} : vector<4x200xf32> to vector<3x200xf32>
    %cst_23 = arith.constant 0.000000e+00 : f32
    %34 = vector.shape_cast %13 : vector<1x200xi1> to vector<1x200xi1>
    %35 = vector.broadcast %34 : vector<1x200xi1> to vector<3x200xi1>
    %36 = vector.broadcast %cst_23 : f32 to vector<3x200xf32>
    %37 = arith.select %35, %36, %33 : vector<3x200xi1>, vector<3x200xf32>
    %c0_24 = arith.constant 0 : index
    %c0_25 = arith.constant 0 : index
    %38 = vector.load %arg8[%c0_24, %c0_25] : memref<3x200xf32, #tpu.memory_space<vmem>>, vector<3x200xf32>
    tpu.vector_store %arg8[%c0_24, %c0_25], %37 {strides = array<i32>} : memref<3x200xf32, #tpu.memory_space<vmem>>, vector<3x200xf32>,
    return
  }
  func.func @transform_0(%arg0: i32) -> (i32, i32) {
    %c0_i32 = arith.constant 0 : i32
    %c0_i32_0 = arith.constant 0 : i32
    return %c0_i32, %arg0 : i32, i32
  }
  func.func @transform_1(%arg0: i32) -> (i32, i32) {
    %c0_i32 = arith.constant 0 : i32
    %c0_i32_0 = arith.constant 0 : i32
    %c0_i32_1 = arith.constant 0 : i32
    return %c0_i32, %c0_i32_0 : i32, i32
  }
  func.func @transform_2(%arg0: i32) -> (i32, i32) {
    %c0_i32 = arith.constant 0 : i32
    %c0_i32_0 = arith.constant 0 : i32
    %c0_i32_1 = arith.constant 0 : i32
    return %c0_i32, %c0_i32_0 : i32, i32
  }
  func.func @transform_3(%arg0: i32) -> (i32, i32) {
    %c0_i32 = arith.constant 0 : i32
    %c0_i32_0 = arith.constant 0 : i32
    %c0_i32_1 = arith.constant 0 : i32
    return %c0_i32, %c0_i32_0 : i32, i32
  }
  func.func @transform_4(%arg0: i32) -> (i32, i32) {
    %c0_i32 = arith.constant 0 : i32
    %c0_i32_0 = arith.constant 0 : i32
    %c0_i32_1 = arith.constant 0 : i32
    return %c0_i32, %c0_i32_0 : i32, i32
  }
  func.func @transform_5(%arg0: i32) -> (i32, i32) {
    %c0_i32 = arith.constant 0 : i32
    %c0_i32_0 = arith.constant 0 : i32
    %c0_i32_1 = arith.constant 0 : i32
    return %c0_i32, %c0_i32_0 : i32, i32
  }
  func.func @transform_6(%arg0: i32) -> (i32, i32) {
    %c0_i32 = arith.constant 0 : i32
    %c0_i32_0 = arith.constant 0 : i32
    %c0_i32_1 = arith.constant 0 : i32
    return %c0_i32, %c0_i32_0 : i32, i32
  }
  func.func @transform_7(%arg0: i32) -> (i32, i32) {
    %c0_i32 = arith.constant 0 : i32
    %c0_i32_0 = arith.constant 0 : i32
    return %c0_i32, %arg0 : i32, i32
  }
}

</mosaic_0001>

<bundles_post_ra>
// kernel: tpu_custom_call.1
= control target key start
LH: loop header
LB: loop body
LE: loop exit
PB: predicated region body
PF: predicated region fallthrough
CT: control target
= control target key end

     0   :  { %v445_v1 = vmov 0   ;;  %v446_v4 = vmov 0.0   ;;  %s579_s0 = inlined_call_operand.vmem [shape: f32[4,200], index: 0, kind: input, shape index: {}]   ;;  %s580_s1 = inlined_call_operand.vmem [shape: f32[32,4], index: 1, kind: input, shape index: {}]   ;;  %s581_s2 = inlined_call_operand.vmem [shape: f32[32,1], index: 2, kind: input, shape index: {}]   ;;  %s582_s3 = inlined_call_operand.vmem [shape: f32[32,32], index: 3, kind: input, shape index: {}]   ;;  %s583_s4 = inlined_call_operand.vmem [shape: f32[32,1], index: 4, kind: input, shape index: {}]   ;;  %s584_s5 = inlined_call_operand.vmem [shape: f32[4,32], index: 5, kind: input, shape index: {}]   ;;  %s585_s6 = inlined_call_operand.vmem [shape: f32[4,1], index: 6, kind: input, shape index: {}]   ;;  %s586_s7 = inlined_call_operand.hbm [shape: f32[3,200], index: 7, kind: output, shape index: {}]  }
   0x1   :  { %v27_v0 = vld [vmem:[%s579_s0] sm:$0xff]  ;;  %417 = vset.pattern.permute.xlu1 %v445_v1  ;;  %v61_v2 = vld [vmem:[%s581_s2 + $0x8] sm:$0xff]  ;;  %416 = vset.pattern.permute.xlu0 %v445_v1  ;;  %v63_v3 = vld [vmem:[%s581_s2 + $0x18] sm:$0xff] }
   0x2   :  { %vm28_vm0 = vcmp.lt.f32.partialorder %v27_v0, -1.03  ;;  %vm29_vm1 = vcmp.gt.f32.partialorder %v27_v0, 1.03  ;;  %71 = vperm.xlu1 %417, %v61_v2   ;;  %418 = vset.pattern.permute.xlu2 %v445_v1 }
   0x3   :  { %vm30_vm2 = vmor %vm28_vm0, %vm29_vm1  ;;  %81 = vperm.xlu0 %416, %v63_v3  }
   0x4   :  { %v31_v5 = vsel %vm30_vm2, 1.0, %v446_v4 }
   0x5   :  { %12 = vsyncpa [#allocation3], 0  ;;  %33 = vst [vmem:[#allocation1] ss:$2 sm:$0xff] %v31_v5  ;;  %v60_v6 = vld [vmem:[%s581_s2] sm:$0xff]  ;;  %v62_v7 = vld [vmem:[%s581_s2 + $0x10] sm:$0xff] }
   0x6   :  { %v176_v10 = vld [vmem:[%s583_s4] sm:$0xff]  ;;  %v177_v11 = vld [vmem:[%s583_s4 + $0x8] sm:$0xff]  ;;  %vm101_vm3 = vcmask 1043456   ;;  %vm88_vm4 = vcmask 31744   ;;  %v58_v16 = vld [vmem:[%s580_s1 + $0x10] sm:$0xff]  ;;  %vm200_vm5 = vcmask 261120  }
   0x7   :  { %v56_v12 = vld [vmem:[%s580_s1] sm:$0xff]  ;;  %v57_v15 = vld [vmem:[%s580_s1 + $0x8] sm:$0xff]  ;;  %v59_v17 = vld [vmem:[%s580_s1 + $0x18] sm:$0xff]  ;;  %vm46_vm6 = vcmask 583680   ;;  %vm38_vm7 = vcmask 1042432   ;;  %vm364_vm10 = vcmask 1041409  }
   0x8   :  { %v179_v38 = vld [vmem:[%s583_s4 + $0x18] sm:$0xff]  ;;  %v172_v47 = vld [vmem:[%s582_s3] sm:$0xff]  ;;  %v178_v48 = vld [vmem:[%s583_s4 + $0x10] sm:$0xff]  ;;  %vm366_vm11 = vcmask 1045509   ;;  %vm374_vm12 = vcmask 587780   ;;  %vm369_vm13 = vcmask 1042434  }
   0x9   :  { %197 = vperm.xlu2 %418, %v179_v38   ;;  %v173_v49 = vld [vmem:[%s582_s3 + $0x8] sm:$0xff]  ;;  %v280_v50 = vld [vmem:[%s585_s6] sm:$0xf]  ;;  %v174_v51 = vld [vmem:[%s582_s3 + $0x10] sm:$0xff]  ;;  %s384_s12 = sshll.u32 %s586_s7, 4  ;;  %vm371_vm14 = vcmask 1046534   ;;  %s385_s12 = int_to_ptr.hbm [resolvable:$true] %s384_s12 }
   0xa   :  { %66 = vperm.xlu1 %417, %v60_v6   ;;  %v175_v52 = vld [vmem:[%s582_s3 + $0x18] sm:$0xff]  ;;  %vm375_vm15 = vmor %vm374_vm12, %vm38_vm7 }
   0xb   :  { %76 = vperm.xlu0 %416, %v62_v7  }
   0xc   :  { %v503_v8 = vld.sshfl [vmem:[#allocation1] sm:$0xff pattern:$0x75316420]  ;;  %v505_v9 = vld.sshfl [vmem:[#allocation1 + $0x8] sm:$0xff pattern:$0x75316420] }
   0xd   :  { %85 = vst [vmem:[#allocation1] ss:$2 sm:$0xff] %v27_v0 }
  0x11   :  { %192 = vperm.xlu2 %418, %v178_v48  }
  0x12   :  { %182 = vperm.xlu1 %417, %v176_v10  }
  0x13   :  { %187 = vperm.xlu0 %416, %v177_v11  }
  0x14   :  { %v86_v13 = vld.sshfl [vmem:[#allocation1] sm:$0xff pattern:$0x75316420]  ;;  %v87_v14 = vld.sshfl [vmem:[#allocation1 + $0x8] sm:$0xff pattern:$0x75316420] }
  0x15   :  { %393 = vmatpush.msk.msra.mxu0 %vm101_vm3, %v86_v13  ;;  %398 = vmatpush.msk.msra.mxu1 %vm101_vm3, %v87_v14 }
  0x16   :  { %394 = vmatmul.msk.f32.vlgmr.msra.gmra.mxu0 %vm88_vm4, %v56_v12  ;;  %399 = vmatmul.msk.f32.vlgmr.msra.gmra.mxu1 %vm88_vm4, %v56_v12 }
  0x19   :  { %283 = vperm.xlu2 %418, %v280_v50  }
  0x1e   :  { %395 = vmatmul.msk.f32.gmra.mxu0 %vm88_vm4, %v57_v15  ;;  %400 = vmatmul.msk.f32.gmra.mxu1 %vm88_vm4, %v57_v15 }
  0x26   :  { %396 = vmatmul.msk.f32.gmra.mxu0 %vm88_vm4, %v58_v16  ;;  %401 = vmatmul.msk.f32.gmra.mxu1 %vm88_vm4, %v58_v16 }
  0x2e   :  { %397 = vmatmul.msk.f32.gmra.mxu0 %vm88_vm4, %v59_v17  ;;  %402 = vmatmul.msk.f32.gmra.mxu1 %vm88_vm4, %v59_v17 }
  0x63   :  { %v198_v57 = vpop.permute.xlu2 %197 }
  0x6b   :  { %v193_v60 = vpop.permute.xlu2 %192 }
  0x74   :  { %v72_v23 = vpop.permute.xlu1 %71 }
  0x75   :  { %v82_v22 = vpop.permute.xlu0 %81 }
  0x7c   :  { %v67_v33 = vpop.permute.xlu1 %66 }
  0x7d   :  { %v77_v26 = vpop.permute.xlu0 %76 }
  0x84   :  { %v183_v10 = vpop.permute.xlu1 %182 }
  0x85   :  { %v188_v3 = vpop.permute.xlu0 %187 }
  0x93   :  { %v123_v18 = vpop.f32.mrf.mxu0  ;;  %v152_v19 = vpop.f32.mrf.mxu1 }
  0x94   :  { %v124_v39 = vadd.f32 %v123_v18, %v67_v33  ;;  %v153_v40 = vadd.f32 %v152_v19, %v67_v33  ;;  %v279_v19 = vld [vmem:[%s584_s5] sm:$0xf]  ;;  %v284_v33 = vpop.permute.xlu2 %283  ;;  %s447_s5 = smov [#allocation2]  }
  0x95   :  { %s382_s9 = sshll.u32 %s447_s5, 4  ;;  %s383_s9 = int_to_ptr.vmem [resolvable:$true] %s382_s9 }
  0x96   :  { %v164_v45 = vmax.f32 %v124_v39, 0.0  ;;  %v165_v46 = vmax.f32 %v153_v40, 0.0 }
  0x9b   :  { %v126_v20 = vpop.f32.mrf.mxu0  ;;  %v155_v21 = vpop.f32.mrf.mxu1 }
  0x9c   :  { %v127_v34 = vadd.f32 %v126_v20, %v72_v23  ;;  %v156_v35 = vadd.f32 %v155_v21, %v72_v23  ;;  %v47_v20 = vsel %vm46_vm6, %v505_v9, -inf }
  0x9d   :  { %v48_v21 = vrot.slane %v47_v20, 4 }
  0x9e   :  { %v166_v43 = vmax.f32 %v127_v34, 0.0  ;;  %v167_v44 = vmax.f32 %v156_v35, 0.0 }
  0x9f   :  { %v49_v23 = vmax.f32 %v47_v20, %v48_v21 }
  0xa3   :  { %v129_v24 = vpop.f32.mrf.mxu0  ;;  %v158_v25 = vpop.f32.mrf.mxu1 }
  0xa4   :  { %v130_v29 = vadd.f32 %v129_v24, %v77_v26  ;;  %v159_v30 = vadd.f32 %v158_v25, %v77_v26  ;;  %v50_v25 = vrot.slane %v49_v23, 2 }
  0xa6   :  { %v168_v41 = vmax.f32 %v130_v29, 0.0  ;;  %v169_v42 = vmax.f32 %v159_v30, 0.0 }
  0xab   :  { %v132_v27 = vpop.f32.mrf.mxu0  ;;  %v161_v28 = vpop.f32.mrf.mxu1 }
  0xac   :  { %v133_v31 = vadd.f32 %v132_v27, %v82_v22  ;;  %v162_v32 = vadd.f32 %v161_v28, %v82_v22  ;;  %v39_v22 = vsel %vm38_vm7, %v503_v8, -inf  ;;  %v51_v27 = vmax.f32 %v49_v23, %v50_v25 }
  0xad   :  { %v40_v24 = vrot.slane %v39_v22, 4 }
  0xae   :  { %v170_v36 = vmax.f32 %v133_v31, 0.0  ;;  %v171_v37 = vmax.f32 %v162_v32, 0.0  ;;  %v52_v29 = vrot.slane %v51_v27, 1 }
  0xaf   :  { %v41_v26 = vmax.f32 %v39_v22, %v40_v24 }
  0xb0   :  { %225 = vmatpush.msra.mxu2 %v170_v36  ;;  %254 = vmatpush.msra.mxu3 %v171_v37  ;;  %v53_v31 = vmax.f32 %v51_v27, %v52_v29 }
  0xb1   :  { %v42_v28 = vrot.slane %v41_v26, 2 }
  0xb2   :  { %226 = vmatpush.msra.mxu2 %v168_v41  ;;  %255 = vmatpush.msra.mxu3 %v169_v42  ;;  %vm55_vm8 = vcmp.gt.f32.partialorder %v53_v31, 0.0 }
  0xb3   :  { %v43_v30 = vmax.f32 %v41_v26, %v42_v28 }
  0xb4   :  { %227 = vmatpush.msra.mxu2 %v166_v43  ;;  %256 = vmatpush.msra.mxu3 %v167_v44 }
  0xb5   :  { %v44_v32 = vrot.slane %v43_v30, 1 }
  0xb6   :  { %228 = vmatpush.msra.mxu2 %v164_v45  ;;  %257 = vmatpush.msra.mxu3 %v165_v46 }
  0xb7   :  { %403 = vmatmul.msk.f32.vlgmr.msra.gmra.mxu2 %vm200_vm5, %v172_v47  ;;  %407 = vmatmul.msk.f32.vlgmr.msra.gmra.mxu3 %vm200_vm5, %v172_v47  ;;  %v45_v37 = vmax.f32 %v43_v30, %v44_v32 }
  0xb9   :  { %vm54_vm9 = vcmp.gt.f32.partialorder %v45_v37, 0.0 }
  0xbf   :  { %404 = vmatmul.msk.f32.gmra.mxu2 %vm200_vm5, %v173_v49  ;;  %408 = vmatmul.msk.f32.gmra.mxu3 %vm200_vm5, %v173_v49 }
  0xc7   :  { %405 = vmatmul.msk.f32.gmra.mxu2 %vm200_vm5, %v174_v51  ;;  %409 = vmatmul.msk.f32.gmra.mxu3 %vm200_vm5, %v174_v51 }
  0xcf   :  { %406 = vmatmul.msk.f32.gmra.mxu2 %vm200_vm5, %v175_v52  ;;  %410 = vmatmul.msk.f32.gmra.mxu3 %vm200_vm5, %v175_v52 }
 0x13a   :  { %v230_v53 = vpop.f32.mrf.mxu2  ;;  %v259_v54 = vpop.f32.mrf.mxu3 }
 0x13b   :  { %v231_v11 = vadd.f32 %v230_v53, %v183_v10  ;;  %v260_v12 = vadd.f32 %v259_v54, %v183_v10 }
 0x13d   :  { %v271_v17 = vmax.f32 %v231_v11, 0.0  ;;  %v272_v18 = vmax.f32 %v260_v12, 0.0 }
 0x142   :  { %v233_v55 = vpop.f32.mrf.mxu2  ;;  %v262_v56 = vpop.f32.mrf.mxu3 }
 0x143   :  { %v234_v4 = vadd.f32 %v233_v55, %v188_v3  ;;  %v263_v5 = vadd.f32 %v262_v56, %v188_v3 }
 0x145   :  { %v273_v15 = vmax.f32 %v234_v4, 0.0  ;;  %v274_v16 = vmax.f32 %v263_v5, 0.0 }
 0x14a   :  { %v236_v58 = vpop.f32.mrf.mxu2  ;;  %v265_v59 = vpop.f32.mrf.mxu3 }
 0x14b   :  { %v237_v63 = vadd.f32 %v236_v58, %v193_v60  ;;  %v266_v0 = vadd.f32 %v265_v59, %v193_v60 }
 0x14d   :  { %v275_v13 = vmax.f32 %v237_v63, 0.0  ;;  %v276_v14 = vmax.f32 %v266_v0, 0.0 }
 0x152   :  { %v239_v61 = vpop.f32.mrf.mxu2  ;;  %v268_v62 = vpop.f32.mrf.mxu3 }
 0x153   :  { %v240_v1 = vadd.f32 %v239_v61, %v198_v57  ;;  %v269_v2 = vadd.f32 %v268_v62, %v198_v57 }
 0x155   :  { %v277_v6 = vmax.f32 %v240_v1, 0.0  ;;  %v278_v7 = vmax.f32 %v269_v2, 0.0 }
 0x157   :  { %301 = vmatpush.msrb.mxu0 %v277_v6  ;;  %321 = vmatpush.msrb.mxu1 %v278_v7 }
 0x159   :  { %302 = vmatpush.msrb.mxu0 %v275_v13  ;;  %322 = vmatpush.msrb.mxu1 %v276_v14 }
 0x15b   :  { %303 = vmatpush.msrb.mxu0 %v273_v15  ;;  %323 = vmatpush.msrb.mxu1 %v274_v16 }
 0x15d   :  { %304 = vmatpush.msrb.mxu0 %v271_v17  ;;  %324 = vmatpush.msrb.mxu1 %v272_v18 }
 0x15e   :  { %411 = vmatmul.msk.f32.vlgmr.msrb.gmra.mxu0 %vm200_vm5, %v279_v19  ;;  %412 = vmatmul.msk.f32.vlgmr.msrb.gmra.mxu1 %vm200_vm5, %v279_v19 }
 0x1db   :  { %v306_v34 = vpop.f32.mrf.mxu0  ;;  %v326_v35 = vpop.f32.mrf.mxu1 }
 0x1dc   :  { %v307_v36 = vadd.f32 %v306_v34, %v284_v33  ;;  %v327_v9 = vadd.f32 %v326_v35, %v284_v33 }
 0x1de   :  { %v335_v38 = vrot.slane %v307_v36, 1  ;;  %v336_v39 = vrot.slane %v327_v9, 1  ;;  %v337_v8 = vrot.slane %v307_v36, 2  ;;  %v338_v40 = vrot.slane %v327_v9, 2 }
 0x1df   :  { %v346_v41 = vsel %vm55_vm8, 0.0, %v327_v9  ;;  %v345_v50 = vsel %vm54_vm9, 0.0, %v307_v36 }
 0x1e0   :  { %v348_v42 = vsel %vm55_vm8, 0.0, %v336_v39  ;;  %v350_v43 = vsel %vm55_vm8, 0.0, %v338_v40  ;;  %v357_v44 = vrot.slane %v346_v41, 4  ;;  %v347_v46 = vsel %vm54_vm9, 0.0, %v335_v38 }
 0x1e1   :  { %v358_v45 = vrot.slane %v348_v42, 4  ;;  %v359_v47 = vrot.slane %v350_v43, 4  ;;  %v349_v48 = vsel %vm54_vm9, 0.0, %v337_v8 }
 0x1e2   :  { %v360_v53 = vsel %vm101_vm3, %v345_v50, %v357_v44 }
 0x1e3   :  { %v361_v49 = vsel %vm101_vm3, %v347_v46, %v358_v45  ;;  %v362_v52 = vsel %vm101_vm3, %v349_v48, %v359_v47 }
 0x1e4   :  { %v363_v51 = vrot.slane %v361_v49, 7  ;;  %v368_v55 = vrot.slane %v362_v52, 6 }
 0x1e6   :  { %v365_v54 = vsel %vm364_vm10, %v363_v51, %v360_v53 }
 0x1e7   :  { %v367_v56 = vsel %vm366_vm11, %v363_v51, %v365_v54 }
 0x1e8   :  { %v370_v57 = vsel %vm369_vm13, %v368_v55, %v367_v56 }
 0x1e9   :  { %v372_v58 = vsel %vm371_vm14, %v368_v55, %v370_v57 }
 0x1ea   :  { %376 = vst.msk [vmem:[#allocation2] sm:$0x77] %vm375_vm15, %v372_v58 }
 0x1eb   :  { %387 = dma.vmem_to_hbm [thread:$0]  %s383_s9, 128, %s385_s12, [#allocation3]  }
 0x1ec   :  { %443 = dma.done.wait [#allocation3], 128  }
 0x1ed   :  { %444 = vsyncadd [#allocation3], 4294967168 }
 0x1ee   :  { %392 = vsyncpa [#allocation3], 1 }

</bundles_post_ra>
